<compile_context>
chip_gen: v7x
topology: tpu7x:2x2x1
jax: 0.10.0
libtpu: 0.0.40
codegen_flags: <defaults>
</compile_context>

<pallas_src>
import jax
import jax.numpy as jnp
from jax.experimental import pallas as pl
from jax.experimental.pallas import tpu as pltpu

LANE = 128          # lane width (last dim of every tile)
SUBLANE = 8         # f32 sublane count of one vreg
MAX_ROW_TILE = 512  # 512x128 f32 = 256 KiB per input tile (~85% of HBM roofline)
NUM_CORES = 2       # shard the reduction across TensorCores (v7x); harmless on 1-TC chips


def _round_up(a, b):
    return -(-a // b) * b


def multiloss_kernel(x_ref, t_ref, sq_ref, ab_ref):
    """Fused MSE + L1 partial sums.

    x_ref, t_ref : VMEM (row_tile, LANE) input tiles.
    sq_ref, ab_ref : VMEM (SUBLANE, LANE) per-core partial-sum outputs; the
        output block index depends only on the leading ("parallel") grid axis,
        so the block stays resident across the inner reduction axis.
    """
    @pl.when(pl.program_id(1) == 0)
    def _():
        sq_ref[...] = jnp.zeros_like(sq_ref)
        ab_ref[...] = jnp.zeros_like(ab_ref)

    d = (x_ref[...] - t_ref[...]).astype(jnp.float32)
    # Regroup whole (8,128) vregs; reduction over axis 0 is pure VPU adds
    # (no cross-lane/cross-sublane XLU work in the hot loop).
    d3 = d.reshape(-1, SUBLANE, LANE)
    sq_ref[...] += jnp.sum(d3 * d3, axis=0)
    ab_ref[...] += jnp.sum(jnp.abs(d3), axis=0)


def multi_loss(x, target, coefs):
    """loss = coefs[0] * MSE(x, target) + coefs[1] * L1(x, target)."""
    assert x.shape == target.shape
    n = x.size
    rows = -(-n // LANE)

    # Shard across cores only if there is at least one (8,128) tile per core.
    num_parts = NUM_CORES if rows >= NUM_CORES * SUBLANE else 1
    row_tile = min(MAX_ROW_TILE, _round_up(-(-rows // num_parts), SUBLANE))
    padded_rows = _round_up(rows, num_parts * row_tile)
    inner_steps = padded_rows // (num_parts * row_tile)

    xf = x.reshape(-1)
    tf = target.reshape(-1)
    pad = padded_rows * LANE - n
    if pad:
        # Zero-pad both tensors: diff on the padding is 0, contributing nothing
        # to either sum; the mean below divides by the true element count n.
        xf = jnp.concatenate([xf, jnp.zeros((pad,), dtype=xf.dtype)])
        tf = jnp.concatenate([tf, jnp.zeros((pad,), dtype=tf.dtype)])
    x2 = xf.reshape(padded_rows, LANE)
    t2 = tf.reshape(padded_rows, LANE)

    in_spec = pl.BlockSpec((row_tile, LANE),
                           lambda p, i: (p * inner_steps + i, 0))
    out_spec = pl.BlockSpec((SUBLANE, LANE), lambda p, i: (p, 0))

    out_sq, out_ab = pl.pallas_call(
        multiloss_kernel,
        out_shape=(
            jax.ShapeDtypeStruct((num_parts * SUBLANE, LANE), jnp.float32),
            jax.ShapeDtypeStruct((num_parts * SUBLANE, LANE), jnp.float32),
        ),
        grid=(num_parts, inner_steps),
        in_specs=[in_spec, in_spec],
        out_specs=(out_spec, out_spec),
        compiler_params=pltpu.CompilerParams(
            dimension_semantics=("parallel", "arbitrary")),
    )(x2, t2)

    # Tiny final reduce + coefficient/1/N combine stays in plain JAX.
    inv_n = 1.0 / n
    c_mse, c_l1 = coefs
    return (c_mse * inv_n) * jnp.sum(out_sq) + (c_l1 * inv_n) * jnp.sum(out_ab)


if __name__ == "__main__":
    key = jax.random.PRNGKey(0)
    k1, k2 = jax.random.split(key)

    # Small NCHW shapes consistent with an image-loss module.
    B, C, H, W = 2, 4, 16, 16
    x = jax.random.normal(k1, (B, C, H, W), dtype=jnp.float32)
    t = jax.random.normal(k2, (B, C, H, W), dtype=jnp.float32)

    # Deterministic "parameters" of MultiLoss: the coefficient list.
    coefs = (0.7, 0.3)   # MultiLoss([MSELoss(), L1Loss()], (0.7, 0.3))

    loss = multi_loss(x, t, coefs)
    loss = jax.block_until_ready(loss)

    # Pure-JAX reference of the PyTorch forward.
    ref = coefs[0] * jnp.mean((x - t) ** 2) + coefs[1] * jnp.mean(jnp.abs(x - t))
    assert jnp.allclose(loss, ref, rtol=1e-5, atol=1e-5), (float(loss), float(ref))

    print("KERNEL_OK")
</pallas_src>

<mosaic_0001>
module attributes {stable_mosaic.version = 11 : i64} {
  func.func @multiloss_kernel(%arg0: i32, %arg1: i32, %arg2: memref<8x128xf32, #tpu.memory_space<vmem>>, %arg3: memref<8x128xf32, #tpu.memory_space<vmem>>, %arg4: memref<8x128xf32, #tpu.memory_space<vmem>>, %arg5: memref<8x128xf32, #tpu.memory_space<vmem>>) attributes {dimension_semantics = [#tpu.dimension_semantics<parallel>, #tpu.dimension_semantics<arbitrary>], iteration_bounds = array<i64: 2, 1>, scalar_prefetch = 0 : i64, scratch_operands = 0 : i64, tpu.core_type = #tpu.core_type<tc>, window_params = [{transform_indices = @transform_0, window_bounds = array<i64: 8, 128>}, {transform_indices = @transform_1, window_bounds = array<i64: 8, 128>}, {transform_indices = @transform_2, window_bounds = array<i64: 8, 128>}, {transform_indices = @transform_3, window_bounds = array<i64: 8, 128>}]} {
    %c0_i32 = arith.constant 0 : i32
    %0 = arith.cmpi eq, %arg1, %c0_i32 : i32
    %1 = arith.extui %0 : i1 to i32
    %c0_i32_0 = arith.constant 0 : i32
    %2 = arith.cmpi ne, %1, %c0_i32_0 : i32
    scf.if %2 {
      %cst_13 = arith.constant 0.000000e+00 : f32
      %17 = vector.broadcast %cst_13 : f32 to vector<8x128xf32>
      %c0_14 = arith.constant 0 : index
      %c0_15 = arith.constant 0 : index
      %18 = vector.load %arg4[%c0_14, %c0_15] : memref<8x128xf32, #tpu.memory_space<vmem>>, vector<8x128xf32>
      tpu.vector_store %arg4[%c0_14, %c0_15], %17 {strides = array<i32>} : memref<8x128xf32, #tpu.memory_space<vmem>>, vector<8x128xf32>,
      %cst_16 = arith.constant 0.000000e+00 : f32
      %19 = vector.broadcast %cst_16 : f32 to vector<8x128xf32>
      %c0_17 = arith.constant 0 : index
      %c0_18 = arith.constant 0 : index
      %20 = vector.load %arg5[%c0_17, %c0_18] : memref<8x128xf32, #tpu.memory_space<vmem>>, vector<8x128xf32>
      tpu.vector_store %arg5[%c0_17, %c0_18], %19 {strides = array<i32>} : memref<8x128xf32, #tpu.memory_space<vmem>>, vector<8x128xf32>,
    } else {
    }
    %c0 = arith.constant 0 : index
    %c0_1 = arith.constant 0 : index
    %3 = vector.load %arg2[%c0, %c0_1] : memref<8x128xf32, #tpu.memory_space<vmem>>, vector<8x128xf32>
    %c0_2 = arith.constant 0 : index
    %c0_3 = arith.constant 0 : index
    %4 = vector.load %arg3[%c0_2, %c0_3] : memref<8x128xf32, #tpu.memory_space<vmem>>, vector<8x128xf32>
    %5 = arith.subf %3, %4 : vector<8x128xf32>
    %6 = vector.shape_cast %5 : vector<8x128xf32> to vector<1x8x128xf32>
    %c0_4 = arith.constant 0 : index
    %c0_5 = arith.constant 0 : index
    %7 = vector.load %arg4[%c0_4, %c0_5] : memref<8x128xf32, #tpu.memory_space<vmem>>, vector<8x128xf32>
    %8 = arith.mulf %6, %6 : vector<1x8x128xf32>
    %cst = arith.constant dense<0.000000e+00> : vector<8x128xf32>
    %9 = vector.multi_reduction <add>, %8, %cst [0] : vector<1x8x128xf32> to vector<8x128xf32>
    %10 = arith.addf %7, %9 : vector<8x128xf32>
    %c0_6 = arith.constant 0 : index
    %c0_7 = arith.constant 0 : index
    %11 = vector.load %arg4[%c0_6, %c0_7] : memref<8x128xf32, #tpu.memory_space<vmem>>, vector<8x128xf32>
    tpu.vector_store %arg4[%c0_6, %c0_7], %10 {strides = array<i32>} : memref<8x128xf32, #tpu.memory_space<vmem>>, vector<8x128xf32>,
    %c0_8 = arith.constant 0 : index
    %c0_9 = arith.constant 0 : index
    %12 = vector.load %arg5[%c0_8, %c0_9] : memref<8x128xf32, #tpu.memory_space<vmem>>, vector<8x128xf32>
    %13 = math.absf %6 : vector<1x8x128xf32>
    %cst_10 = arith.constant dense<0.000000e+00> : vector<8x128xf32>
    %14 = vector.multi_reduction <add>, %13, %cst_10 [0] : vector<1x8x128xf32> to vector<8x128xf32>
    %15 = arith.addf %12, %14 : vector<8x128xf32>
    %c0_11 = arith.constant 0 : index
    %c0_12 = arith.constant 0 : index
    %16 = vector.load %arg5[%c0_11, %c0_12] : memref<8x128xf32, #tpu.memory_space<vmem>>, vector<8x128xf32>
    tpu.vector_store %arg5[%c0_11, %c0_12], %15 {strides = array<i32>} : memref<8x128xf32, #tpu.memory_space<vmem>>, vector<8x128xf32>,
    return
  }
  func.func @transform_0(%arg0: i32, %arg1: i32) -> (i32, i32) {
    %c1_i32 = arith.constant 1 : i32
    %0 = arith.muli %arg0, %c1_i32 : i32
    %1 = arith.addi %0, %arg1 : i32
    %c0_i32 = arith.constant 0 : i32
    %c0_i32_0 = arith.constant 0 : i32
    return %1, %c0_i32 : i32, i32
  }
  func.func @transform_1(%arg0: i32, %arg1: i32) -> (i32, i32) {
    %c1_i32 = arith.constant 1 : i32
    %0 = arith.muli %arg0, %c1_i32 : i32
    %1 = arith.addi %0, %arg1 : i32
    %c0_i32 = arith.constant 0 : i32
    %c0_i32_0 = arith.constant 0 : i32
    return %1, %c0_i32 : i32, i32
  }
  func.func @transform_2(%arg0: i32, %arg1: i32) -> (i32, i32) {
    %c0_i32 = arith.constant 0 : i32
    %c0_i32_0 = arith.constant 0 : i32
    return %arg0, %c0_i32 : i32, i32
  }
  func.func @transform_3(%arg0: i32, %arg1: i32) -> (i32, i32) {
    %c0_i32 = arith.constant 0 : i32
    %c0_i32_0 = arith.constant 0 : i32
    return %arg0, %c0_i32 : i32, i32
  }
}

</mosaic_0001>

<bundles_post_ra>
// kernel: tpu_custom_call.1
= control target key start
LH: loop header
LB: loop body
LE: loop exit
PB: predicated region body
PF: predicated region fallthrough
CT: control target
= control target key end

     0   :  { %9 = vsyncpa [#allocation3], 0  ;;  %s985_s0 = inlined_call_operand.hbm [shape: f32[16,128], index: 0, kind: input, shape index: {}]   ;;  %s986_s1 = inlined_call_operand.hbm [shape: f32[16,128], index: 1, kind: input, shape index: {}]   ;;  %s987_s2 = inlined_call_operand.hbm [shape: f32[16,128], index: 2, kind: output, shape index: {0}]   ;;  %s988_s3 = inlined_call_operand.hbm [shape: f32[16,128], index: 3, kind: output, shape index: {1}]  }
   0x1   :  { %11 = vsyncpa [#allocation3 + $0x1], 0 }
   0x2   :  { %12 = vsyncpa [#allocation6], 0 }
   0x3   :  { %14 = vsyncpa [#allocation6 + $0x1], 0 }
   0x4   :  { %15 = vsyncpa [#allocation4], 0 }
   0x5   :  { %17 = vsyncpa [#allocation4 + $0x1], 0 }
   0x6   :  { %18 = vsyncpa [#allocation9], 0 }
   0x7   :  { %20 = vsyncpa [#allocation9 + $0x1], 0  ;;  %s736_s12 = smov 0   ;;  %s738_s13 = smov 0  }
   0x8   :  { %s740_s14 = smov 0   ;;  %s742_s15 = smov 0  }
   0x9   :  { %s744_s16 = smov 0   ;;  %s746_s17 = smov 0  }
   0xa LB: > { %s440_s18 = sadd.s32 4294967295, %s710_s17   ;;  %s441_s19 = sadd.s32 4294967294, %s710_s17   ;;  %s710_s17 = sphi %s746_s17, %s26_s17   ;;  %s706_s16 = sphi %s744_s16, %s1008_s16   ;;  %s702_s15 = sphi %s742_s15, %s1007_s15   ;;  %s698_s14 = sphi %s740_s14, %s1006_s14   ;;  %s694_s13 = sphi %s738_s13, %s1005_s13   ;;  %s690_s12 = sphi %s736_s12, %s1004_s12  }
   0xb   : > { %s38_s20 = sadd.s32 1, %s706_s16  ;;  %s47_s21 = sadd.s32 1, %s698_s14 }
   0xc   : > { %p40_p0 = scmp.ge.s32.totalorder %s38_s20, 2  ;;  %p54_p1 = scmp.ne.s32.totalorder %s698_s14, %s694_s13 }
   0xd   : > { %p55_p2 = scmp.eq.s32.totalorder %s710_s17, 0  ;;  %p60_p3 = scmp.ne.s32.totalorder %s694_s13, %s690_s12 }
   0xe   : > { %s1010_s20 = smov (%p40_p0, %s38_s20), 0  ;;  %p61_p5 = scmp.eq.s32.totalorder %s440_s18, 0 }
   0xf   : > { %p777_p4 = por %p55_p2, %p54_p1  ;;  %s44_s23 = ssub.s32 %s706_s16, %s1010_s20 }
  0x10   : > { %p112_p6 = scmp.eq.s32.totalorder %s440_s18, 1  ;;  %p45_p7 = scmp.eq.s32.totalorder %s44_s23, 0 }
  0x11   : > { %p783_p8 = por %p61_p5, %p60_p3  ;;  %p118_p10 = scmp.eq.s32.totalorder %s441_s19, 1 }
  0x12   : > { %p787_p9 = por %p112_p6, %p54_p1  ;;  %p481_p13 = scmp.lt.s32.totalorder %s710_s17, 2 }
  0x13   : > { %s992_s24 = scalar_select %p783_p8, 1, 0 }
  0x14   : > { %s993_s25 = scalar_select %p787_p9, 1, 0 }
  0x15   : > { %s792_s26 = scalar_select %p45_p7, %s698_s14, %s47_s21  }
  0x16   : > { %p794_p11 = por %p118_p10, %p60_p3  ;;  %s801_s28 = sand.u32 1, %s698_s14  }
  0x17   : > { %s444_s29 = sshll.u32 %s801_s28, 3  ;;  %s445_s30 = sshll.u32 %s706_s16, 7 }
  0x18   : > { %s994_s27 = scalar_select %p794_p11, 1, 0 }
  0x19   : > { %s810_s6 = scalar_lea.hbm %s985_s0, %s445_s30  ;;  %s168_s7 = scalar_lea.vmem [#allocation2], %s444_s29 }
  0x1a   : > { %s176_s8 = sshll.u32 %s168_s7, 4  ;;  %p818_p0 = pnand %p481_p13, %p777_p4  ;;  %s814_s8 = int_to_ptr.vmem [resolvable:$true] %s176_s8 }
  0x1b   : > { %s165_s10 = scalar_lea.sflag [#allocation3], %s801_s28  ;;  %s532_s11 = scalar_lea.hbm %s810_s6, 128 }
  0x1c   : > { %p533_p3 = scmp.ne.s32.totalorder %s810_s6, %s532_s11  ;;  %p534_p5 = pneg %p818_p0 }
  0x1d   : > { %s537_s21 = scalar_lea.hbm %s985_s0, 256  ;;  %p538_p4 = scmp.lt.u32.totalorder %s810_s6, %s985_s0 }
  0x1e   : > { %p535_p6 = pnand %p534_p5, %p533_p3  ;;  %p539_p10 = scmp.lt.u32.totalorder %s537_s21, %s532_s11 }
  0x1f   : > { %p541_p12 = scmp.lt.u32.totalorder %s532_s11, %s810_s6 }
  0x20   : > { %p536_p7 = pneg %p535_p6  ;;  %p540_p13 = por %p539_p10, %p538_p4 }
  0x22   : > { %p542_p1 = por %p541_p12, %p540_p13 }
  0x24   : > { %p543_p2 = pnand %p542_p1, %p536_p7 }
  0x26   : > { %546 = shalt.err (!%p543_p2)
}
  0x27   : > { %s547_s4 = scalar_lea.vmem %s814_s8, 128  ;;  %s712_s5 = smov [#allocation2]  }
  0x28   : > { %p548_p3 = scmp.ne.s32.totalorder %s814_s8, %s547_s4  ;;  %s552_s7 = sshll.u32 %s712_s5, 4  ;;  %s553_s7 = int_to_ptr.vmem [resolvable:$false] %s552_s7 }
  0x29   : > { %s554_s18 = scalar_lea.vmem %s553_s7, 256  ;;  %p555_p9 = scmp.lt.s32.totalorder %s814_s8, %s553_s7 }
  0x2a   : > { %p550_p6 = pnand %p548_p3, %p534_p5  ;;  %p556_p4 = scmp.lt.s32.totalorder %s554_s18, %s547_s4 }
  0x2c   : > { %p551_p11 = pneg %p550_p6  ;;  %p557_p10 = por %p556_p4, %p555_p9 }
  0x2e   : > { %p558_p12 = pnand %p557_p10, %p551_p11 }
  0x30   : > { %561 = shalt.err (!%p558_p12)
}
  0x31   : > { %470 = dma.hbm_to_vmem [thread:$0]  (!%p818_p0), %s810_s6, 128, %s814_s8, %s165_s10  }
  0x32   : > { %p996_p1 = scmp.lt.s32.totalorder %s710_s17, 3  ;;  %p997_p2 = scmp.ge.s32.totalorder %s710_s17, 1 }
  0x33   : > { %s863_s22 = scalar_lea.hbm %s986_s1, %s445_s30  ;;  %s187_s23 = scalar_lea.vmem [#allocation5], %s444_s29 }
  0x34   : > { %p854_p7 = pnand %p997_p2, %p996_p1  ;;  %s195_s4 = sshll.u32 %s187_s23, 4  ;;  %s196_s4 = int_to_ptr.vmem [resolvable:$true] %s195_s4 }
  0x35   : > { %s184_s6 = scalar_lea.sflag [#allocation6], %s801_s28  ;;  %s562_s8 = scalar_lea.hbm %s863_s22, 128 }
  0x36   : > { %s998_s11 = scalar_select %p854_p7, 1, 0 }
  0x37   : > { %p563_p9 = scmp.ne.s32.totalorder %s863_s22, %s562_s8  ;;  %s567_s30 = scalar_lea.hbm %s986_s1, 256 }
  0x38   : > { %p568_p3 = scmp.lt.u32.totalorder %s863_s22, %s986_s1  ;;  %p569_p6 = scmp.lt.u32.totalorder %s567_s30, %s562_s8 }
  0x39   : > { %p565_p11 = pnand %p563_p9, %p534_p5  ;;  %p571_p10 = scmp.lt.u32.totalorder %s562_s8, %s863_s22 }
  0x3a   : > { %p570_p4 = por %p569_p6, %p568_p3 }
  0x3b   : > { %p566_p13 = pneg %p565_p11 }
  0x3c   : > { %p572_p12 = por %p571_p10, %p570_p4 }
  0x3e   : > { %p573_p1 = pnand %p572_p12, %p566_p13 }
  0x40   : > { %576 = shalt.err (!%p573_p1)
}
  0x41   : > { %s577_s28 = scalar_lea.vmem %s196_s4, 128  ;;  %s713_s29 = smov [#allocation5]  }
  0x42   : > { %p578_p2 = scmp.ne.s32.totalorder %s196_s4, %s577_s28  ;;  %s582_s19 = sshll.u32 %s713_s29, 4  ;;  %s583_s19 = int_to_ptr.vmem [resolvable:$false] %s582_s19 }
  0x43   : > { %s584_s21 = scalar_lea.vmem %s583_s19, 256  ;;  %p585_p8 = scmp.lt.s32.totalorder %s196_s4, %s583_s19 }
  0x44   : > { %p580_p9 = pnand %p578_p2, %p534_p5  ;;  %p586_p7 = scmp.lt.s32.totalorder %s584_s21, %s577_s28 }
  0x46   : > { %p581_p11 = pneg %p580_p9  ;;  %p587_p3 = por %p586_p7, %p585_p8 }
  0x48   : > { %p588_p6 = pnand %p587_p3, %p581_p11 }
  0x4a   : > { %591 = shalt.err (!%p588_p6)
}
  0x4b   : > { %473 = dma.hbm_to_vmem [thread:$0]  (!%p818_p0), %s863_s22, 128, %s196_s4, %s184_s6  }
  0x4c   : > { %p999_p13 = scmp.ne.s32.totalorder %s998_s11, 0 }
  0x4d   : > { %s890_s23 = sand.u32 (!%p999_p13), 1, %s694_s13   ;;  %p1000_p5 = scmp.ne.s32.totalorder (!%p999_p13), %s992_s24, 0 }
  0x4e   : > { %204 = sbr.rel (%p999_p13) target bundleno = 138 (0x8a), region = 28  ;;  %s449_s8 = sshll.u32 (!%p999_p13), %s890_s23, 3 }
  0x4f   : > { %s207_s10 = scalar_lea.sflag (!%p999_p13), [#allocation3], %s890_s23  ;;  %s210_s5 = scalar_lea.vmem (!%p999_p13), [#allocation2], %s449_s8 }
  0x55   : > { %673 = dma.done.wait (%p1000_p5), %s207_s10, 128  }
  0x56   : > { %675 = vsyncadd (%p1000_p5), %s207_s10, 4294967168  ;;  %s216_s9 = scalar_lea.sflag [#allocation6], %s890_s23  ;;  %s219_s22 = scalar_lea.vmem [#allocation5], %s449_s8 }
  0x57   : > { %677 = dma.done.wait (%p1000_p5), %s216_s9, 128  }
  0x58   : > { %679 = vsyncadd (%p1000_p5), %s216_s9, 4294967168  ;;  %v260_v0 = vld [vmem:[%s210_s5] sm:$0xff]  ;;  %v261_v1 = vld [vmem:[%s219_s22] sm:$0xff]  ;;  %s455_s11 = sshll.u32 %s702_s15, 7  ;;  %s244_s4 = scalar_lea.vmem [#allocation7], %s449_s8 }
  0x59   : > { %v262_v2 = vsub.f32 %v260_v0, %v261_v1  ;;  %s292_s6 = sshll.u32 %s244_s4, 4  ;;  %s251_s30 = scalar_lea.vmem [#allocation8], %s449_s8  ;;  %s909_s6 = int_to_ptr.vmem [resolvable:$true] %s292_s6 }
  0x5a   : > { %s305_s7 = sshll.u32 %s251_s30, 4  ;;  %s907_s29 = scalar_lea.hbm %s987_s2, %s455_s11  ;;  %s916_s7 = int_to_ptr.vmem [resolvable:$true] %s305_s7 }
  0x5b   : > { %v264_v3 = vmul.f32 %v262_v2, %v262_v2  ;;  %v269_v4 = vand.u32 2147483647, %v262_v2  ;;  %s914_s15 = scalar_lea.hbm %s988_s3, %s455_s11  ;;  %s274_s21 = scalar_lea.sflag [#allocation4], %s890_s23 }
  0x5c   : > { %s592_s8 = scalar_lea.vmem %s909_s6, 128  ;;  %p1001_p0 = scmp.ne.s32.totalorder %s993_s25, 0 }
  0x5d   : > { %267 = vst [vmem:[%s244_s4] sm:$0xff] %v264_v3  ;;  %272 = vst [vmem:[%s251_s30] sm:$0xff] %v269_v4  ;;  %p593_p8 = scmp.ne.s32.totalorder %s909_s6, %s592_s8  ;;  %s714_s10 = smov [#allocation7]  }
  0x5e   : > { %s596_s5 = sshll.u32 %s714_s10, 4  ;;  %s597_s5 = int_to_ptr.vmem [resolvable:$false] %s596_s5 }
  0x5f   : > { %p594_p7 = pnand %p593_p8, %p1001_p0  ;;  %s598_s9 = scalar_lea.vmem %s597_s5, 256 }
  0x60   : > { %p599_p10 = scmp.lt.s32.totalorder %s909_s6, %s597_s5  ;;  %p600_p12 = scmp.lt.s32.totalorder %s598_s9, %s592_s8 }
  0x61   : > { %p595_p4 = pneg %p594_p7 }
  0x62   : > { %p601_p1 = por %p600_p12, %p599_p10 }
  0x64   : > { %p602_p2 = pnand %p601_p1, %p595_p4 }
  0x66   : > { %605 = shalt.err (!%p602_p2)
}
  0x67   : > { %s606_s22 = scalar_lea.hbm %s907_s29, 128  ;;  %s610_s30 = scalar_lea.hbm %s987_s2, 256 }
  0x68   : > { %p607_p9 = scmp.ne.s32.totalorder %s907_s29, %s606_s22  ;;  %p611_p6 = scmp.lt.u32.totalorder %s907_s29, %s987_s2 }
  0x69   : > { %p612_p13 = scmp.lt.u32.totalorder %s610_s30, %s606_s22  ;;  %p614_p8 = scmp.lt.u32.totalorder %s606_s22, %s907_s29 }
  0x6a   : > { %p608_p11 = pnand %p607_p9, %p1001_p0 }
  0x6b   : > { %p613_p5 = por %p612_p13, %p611_p6 }
  0x6c   : > { %p609_p3 = pneg %p608_p11 }
  0x6d   : > { %p615_p7 = por %p614_p8, %p613_p5 }
  0x6f   : > { %p616_p4 = pnand %p615_p7, %p609_p3 }
  0x71   : > { %619 = shalt.err (!%p616_p4)
}
  0x72   : > { %463 = dma.vmem_to_hbm [thread:$0]  (%p1001_p0), %s909_s6, 128, %s907_s29, %s274_s21  }
  0x73   : > { %s279_s24 = scalar_lea.sflag [#allocation9], %s890_s23  ;;  %s620_s19 = scalar_lea.vmem %s916_s7, 128 }
  0x74   : > { %p621_p10 = scmp.ne.s32.totalorder %s916_s7, %s620_s19  ;;  %s715_s8 = smov [#allocation8]  }
  0x75   : > { %s624_s10 = sshll.u32 %s715_s8, 4  ;;  %s625_s10 = int_to_ptr.vmem [resolvable:$false] %s624_s10 }
  0x76   : > { %p622_p12 = pnand %p621_p10, %p1001_p0  ;;  %s626_s5 = scalar_lea.vmem %s625_s10, 256 }
  0x77   : > { %p627_p2 = scmp.lt.s32.totalorder %s916_s7, %s625_s10  ;;  %p628_p9 = scmp.lt.s32.totalorder %s626_s5, %s620_s19 }
  0x78   : > { %p623_p1 = pneg %p622_p12 }
  0x79   : > { %p629_p11 = por %p628_p9, %p627_p2 }
  0x7b   : > { %p630_p3 = pnand %p629_p11, %p623_p1 }
  0x7d   : > { %633 = shalt.err (!%p630_p3)
}
  0x7e   : > { %s634_s23 = scalar_lea.hbm %s914_s15, 128  ;;  %s638_s21 = scalar_lea.hbm %s988_s3, 256 }
  0x7f   : > { %p635_p6 = scmp.ne.s32.totalorder %s914_s15, %s634_s23  ;;  %p639_p8 = scmp.lt.u32.totalorder %s914_s15, %s988_s3 }
  0x80   : > { %p640_p7 = scmp.lt.u32.totalorder %s638_s21, %s634_s23  ;;  %p642_p10 = scmp.lt.u32.totalorder %s634_s23, %s914_s15 }
  0x81   : > { %p636_p13 = pnand %p635_p6, %p1001_p0 }
  0x82   : > { %p641_p4 = por %p640_p7, %p639_p8 }
  0x83   : > { %p637_p5 = pneg %p636_p13 }
  0x84   : > { %p643_p12 = por %p642_p10, %p641_p4 }
  0x86   : > { %p644_p1 = pnand %p643_p12, %p637_p5 }
  0x88   : > { %647 = shalt.err (!%p644_p1)
}
  0x89   : > { %464 = dma.vmem_to_hbm [thread:$0]  (%p1001_p0), %s916_s7, 128, %s914_s15, %s279_s24  }
  0x8a PF: > { %s317_s11 = sand.u32 1, %s690_s12   ;;  %p1002_p2 = scmp.ne.s32.totalorder %s994_s27, 0 }
  0x8b   : > { %p1003_p9 = scmp.ge.s32.totalorder %s710_s17, 2  ;;  %s318_s4 = scalar_lea.sflag [#allocation4], %s317_s11 }
  0x8d   : > { %p475_p11 = pnand %p1003_p9, %p1002_p2 }
  0x8f   : > { %681 = dma.done.wait (!%p475_p11), %s318_s4, 128  }
  0x90   : > { %683 = vsyncadd (!%p475_p11), %s318_s4, 4294967168  ;;  %s327_s30 = scalar_lea.sflag [#allocation9], %s317_s11 }
  0x91   : > { %685 = dma.done.wait (!%p475_p11), %s327_s30, 128  }
  0x92   : > { %687 = vsyncadd (!%p475_p11), %s327_s30, 4294967168  ;;  %s26_s17 = sadd.s32 1, %s710_s17   ;;  %s1004_s12 = smov %s694_s13 }
  0x93   : > { %p23_p3 = scmp.ge.s32.totalorder %s26_s17, 4   ;;  %s1005_s13 = smov %s698_s14 }
  0x94   : > { %s1006_s14 = smov %s792_s26  ;;  %s1007_s15 = smov %s706_s16 }
  0x95   : > { %s1008_s16 = smov %s1010_s20  ;;  %25 = sbr.rel (!%p23_p3) target bundleno = 10 (0xa), region = 107 }
  0x9c   :  { %332 = vsyncpa [#allocation3], 1 }
  0x9d   :  { %334 = vsyncpa [#allocation3 + $0x1], 1 }
  0x9e   :  { %335 = vsyncpa [#allocation6], 1 }
  0x9f   :  { %337 = vsyncpa [#allocation6 + $0x1], 1 }
  0xa0   :  { %338 = vsyncpa [#allocation4], 1 }
  0xa1   :  { %340 = vsyncpa [#allocation4 + $0x1], 1 }
  0xa2   :  { %341 = vsyncpa [#allocation9], 1 }
  0xa3   :  { %343 = vsyncpa [#allocation9 + $0x1], 1 }

</bundles_post_ra>
